<compile_context>
chip_gen: v7x
topology: tpu7x:2x2x1
jax: 0.10.0
libtpu: 0.0.40
codegen_flags: <defaults>
</compile_context>

<pallas_src>
import jax
import jax.numpy as jnp
import numpy as np
from jax.experimental import pallas as pl
from jax.experimental.pallas import tpu as pltpu


def _choose_tiles(b, nc_blk, hw, itemsize, tile_hw=None, batch_tile=None,
                  target_block_bytes=2 << 20):
    """Pick (batch_tile, hw_tile, n_hw_tiles).

    ~2 MiB blocks keep pass 1 (2 input streams x 2 buffers) and pass 2
    (1 output stream x 2 buffers) far inside v7x's 64 MiB physical VMEM while
    each DMA is large enough (>~0.5 MiB) for the ~85% HBM-roofline regime.
    The hw tile is a multiple of 128 (lane-dense, unmasked stores) unless it
    spans the full H*W extent.  Batch elements are folded per grid step only
    while blocks stay small AND >=2 parallel grid blocks remain (2 v7x TCs).
    """
    row_bytes = nc_blk * itemsize
    if tile_hw is not None:
        t_hw = tile_hw
    elif hw * row_bytes <= target_block_bytes or hw <= 128:
        t_hw = hw
    else:
        t_hw = min(hw, max(128, (target_block_bytes // row_bytes) // 128 * 128))
    n_hw = pl.cdiv(hw, t_hw)

    if batch_tile is not None:
        bt = batch_tile
    else:
        bt = 1
        for cand in range(2, b + 1):
            if b % cand:                                   # full blocks only
                continue
            if cand * t_hw * row_bytes > target_block_bytes:
                break
            if n_hw * (b // cand) < 2:                     # keep 2 TCs busy
                break
            bt = cand
    return bt, t_hw, n_hw


def lighting_net_forward(inner_feat, guide_feat, params, *,
                         tile_hw=None, batch_tile=None):
    """Fused lightingNet forward.

    params = (w_pd1, w_pd2, w_pt1, w_pt2, w_qd1, w_qd2, w_qt1, w_qt2, alphas)
    with the 1x1-conv weights in PyTorch (out_ch, in_ch) orientation and
    alphas = [predict_dir, predict_tmp, post_dir, post_tmp] PReLU slopes.

    Returns (innerFeat_updated, light, glight, tmp, gtmp).  Call through
    jax.jit(lighting_net_forward, donate_argnums=0, ...) for a true zero-copy
    in-place update of innerFeat (matching the PyTorch module's mutation).
    """
    (w_pd1, w_pd2, w_pt1, w_pt2, w_qd1, w_qd2, w_qt1, w_qt2, alphas) = params
    b, c, h, w = inner_feat.shape
    hw = h * w
    nc_dir = w_pd1.shape[1]
    nc_tmp = w_pt1.shape[1]
    num_dir = w_pd2.shape[0]
    num_tmp = w_pt2.shape[0]
    nc_mid = w_pd1.shape[0]
    nc_lit = nc_dir + nc_tmp
    assert c >= nc_lit, "innerFeat must carry at least ncDir+ncTmp channels"

    # Channel rows the kernels touch, rounded up to the 8-sublane granule so
    # the shrunken channel block stays legal without dragging the whole slab.
    # (Prefer ncDir+ncTmp to be a multiple of 8: the pad rows below are pure
    # read+rewrite pass-through in an HBM-bound kernel.)
    nc_blk = nc_lit if nc_lit % 8 == 0 else min(c, ((nc_lit + 7) // 8) * 8)
    pad_rows = nc_blk > nc_lit

    itemsize = int(jnp.dtype(inner_feat.dtype).itemsize)
    bt, t_hw, n_hw = _choose_tiles(b, nc_blk, hw, itemsize,
                                   tile_hw=tile_hw, batch_tile=batch_tile)
    assert b % bt == 0, "batch tile must divide the batch"
    assert t_hw == hw or t_hw % 128 == 0, "hw tile must be lane-dense (x128)"
    n_b = b // bt
    needs_mask = (n_hw * t_hw != hw)          # ragged last hw tile

    inner_r = inner_feat.reshape(b, c, hw)
    guide_r = guide_feat.reshape(b, c, hw)

    # Pre-transpose weights once (outside the kernel) to (in, out) so every
    # in-kernel matmul is plain `x @ W` with no in-kernel transposes.
    wts = tuple(jnp.transpose(wm) for wm in
                (w_pd1, w_pd2, w_pt1, w_pt2, w_qd1, w_qd2, w_qt1, w_qt2))
    n_preds = 2 * (num_dir + num_tmp)         # [light | glight | tmp | gtmp]

    # ------------- pass 1: tiled spatial mean + all FC chains ---------------
    def reduce_kernel(alpha_ref, inner_ref, guide_ref,
                      wpd1_ref, wpd2_ref, wpt1_ref, wpt2_ref,
                      wqd1_ref, wqd2_ref, wqt1_ref, wqt2_ref,
                      preds_ref, up_ref, acc_in_ref, acc_gd_ref):
        j = pl.program_id(1)

        @pl.when(j == 0)
        def _init():
            acc_in_ref[...] = jnp.zeros_like(acc_in_ref)
            acc_gd_ref[...] = jnp.zeros_like(acc_gd_ref)

        x_in = inner_ref[:, 0:nc_lit, :].astype(jnp.float32)
        x_gd = guide_ref[:, 0:nc_lit, :].astype(jnp.float32)
        if needs_mask:
            lane = jax.lax.broadcasted_iota(jnp.int32, x_in.shape, 2)
            valid = (j * t_hw + lane) < hw
            x_in = jnp.where(valid, x_in, 0.0)
            x_gd = jnp.where(valid, x_gd, 0.0)
        acc_in_ref[...] += jnp.sum(x_in, axis=2)       # (bt, nc_lit)
        acc_gd_ref[...] += jnp.sum(x_gd, axis=2)

        @pl.when(j == pl.num_programs(1) - 1)
        def _finalize():
            a_pd = alpha_ref[0]   # predict_dir_relu1
            a_pt = alpha_ref[1]   # predict_tmp_relu1
            a_qd = alpha_ref[2]   # post_dir_relu1
            a_qt = alpha_ref[3]   # post_tmp_relu1
            inv_hw = jnp.float32(1.0 / hw)
            # rows [0, bt) = inner stream, rows [bt, 2*bt) = guide stream.
            feats = jnp.concatenate([acc_in_ref[...], acc_gd_ref[...]],
                                    axis=0) * inv_hw   # (2*bt, nc_lit)

            def fc2(x, w1, w2, a):
                # two chained bias-free 1x1 convs with a shared PReLU between.
                hmid = jnp.dot(x, w1, preferred_element_type=jnp.float32)
                hmid = jnp.where(hmid >= 0, hmid, a * hmid)
                return jnp.dot(hmid, w2, preferred_element_type=jnp.float32)

            pred_dir = fc2(feats[:, 0:nc_dir], wpd1_ref[...], wpd2_ref[...],
                           a_pd)                        # (2*bt, num_dir)
            pred_tmp = fc2(feats[:, nc_dir:nc_lit], wpt1_ref[...], wpt2_ref[...],
                           a_pt)                        # (2*bt, num_tmp)

            # guide-stream predictions drive the post nets
            up_dir = jnp.maximum(
                fc2(pred_dir[bt:2 * bt, :], wqd1_ref[...], wqd2_ref[...], a_qd),
                0.0)                                    # (bt, nc_dir)
            up_tmp = jnp.maximum(
                fc2(pred_tmp[bt:2 * bt, :], wqt1_ref[...], wqt2_ref[...], a_qt),
                0.0)                                    # (bt, nc_tmp)

            # Single packed store per batch block, written exactly once.
            preds_ref[...] = jnp.concatenate(
                [pred_dir[0:bt, :], pred_dir[bt:2 * bt, :],
                 pred_tmp[0:bt, :], pred_tmp[bt:2 * bt, :]], axis=1)
            up_ref[...] = jnp.concatenate([up_dir, up_tmp], axis=1)

    big_block = pl.BlockSpec((bt, nc_blk, t_hw), lambda bi, j: (bi, 0, j))
    weight_specs = [pl.BlockSpec(wm.shape, lambda bi, j: (0, 0)) for wm in wts]

    block_bytes = bt * nc_blk * t_hw * itemsize
    w_bytes = sum(int(x.size) * int(jnp.dtype(x.dtype).itemsize) for x in wts)
    # 2 input streams x 2 double buffers + weights + headroom, v7x-safe cap.
    vmem1 = int(min(48 << 20, max(16 << 20, 4 * block_bytes + w_bytes + (2 << 20))))
    bytes1 = int(2 * b * nc_blk * hw * itemsize + w_bytes
                 + b * (n_preds + nc_lit) * 4)
    flops1 = int(b * (4 * nc_lit * hw
                      + 4 * nc_mid * (nc_lit + num_dir + num_tmp)
                      + 2 * nc_mid * (num_dir + num_tmp + nc_lit)))

    preds_blk, up_blk = pl.pallas_call(
        reduce_kernel,
        grid=(n_b, n_hw),
        in_specs=[pl.BlockSpec(memory_space=pltpu.MemorySpace.SMEM)]  # alphas
                 + [big_block, big_block] + weight_specs,
        out_specs=(
            pl.BlockSpec((None, bt, n_preds), lambda bi, j: (bi, 0, 0)),
            pl.BlockSpec((None, bt, nc_lit), lambda bi, j: (bi, 0, 0)),
        ),
        out_shape=(
            jax.ShapeDtypeStruct((n_b, bt, n_preds), jnp.float32),
            jax.ShapeDtypeStruct((n_b, bt, nc_lit), jnp.float32),
        ),
        scratch_shapes=[pltpu.VMEM((bt, nc_lit), jnp.float32),
                        pltpu.VMEM((bt, nc_lit), jnp.float32)],
        compiler_params=pltpu.CompilerParams(
            dimension_semantics=("parallel", "arbitrary"),
            vmem_limit_bytes=vmem1),
        cost_estimate=pl.CostEstimate(flops=flops1, transcendentals=0,
                                      bytes_accessed=bytes1),
    )(alphas, inner_r, guide_r, *wts)

    preds = preds_blk.reshape(b, n_preds)
    up3d = up_blk.reshape(b, nc_lit)[:, :, None]          # (b, nc_lit, 1)

    # ------------ pass 2: broadcast write-back into innerFeat ---------------
    def broadcast_kernel(up_ref, inner_ref, out_ref):
        vals = jnp.broadcast_to(up_ref[...],
                                (bt, nc_lit, t_hw)).astype(out_ref.dtype)
        if pad_rows:
            out_ref[:, 0:nc_lit, :] = vals
            # rows pulled in only for 8-sublane alignment: pass them through
            out_ref[:, nc_lit:nc_blk, :] = inner_ref[:, nc_lit:nc_blk, :]
        else:
            out_ref[...] = vals

    if pad_rows:
        inner_spec = big_block                      # read + pass through pads
    else:
        inner_spec = pl.BlockSpec(memory_space=pl.ANY)   # alias only, no DMA

    vmem2 = int(min(48 << 20, max(16 << 20,
                                  (4 if pad_rows else 2) * block_bytes
                                  + (2 << 20))))
    bytes2 = int((2 if pad_rows else 1) * b * nc_blk * hw * itemsize
                 + b * nc_lit * 4)

    out_inner = pl.pallas_call(
        broadcast_kernel,
        grid=(n_b, n_hw),
        in_specs=[pl.BlockSpec((bt, nc_lit, 1), lambda bi, j: (bi, 0, 0)),
                  inner_spec],
        out_specs=pl.BlockSpec((bt, nc_blk, t_hw), lambda bi, j: (bi, 0, j)),
        out_shape=jax.ShapeDtypeStruct((b, c, hw), inner_feat.dtype),
        # NOTE: positional input 1 is innerFeat -> aliased to output 0 so the
        # update is in place and untouched extra channels never leave HBM.
        # Do not reorder the pallas_call operands without updating this.
        input_output_aliases={1: 0},
        compiler_params=pltpu.CompilerParams(
            dimension_semantics=("parallel", "parallel"),
            vmem_limit_bytes=vmem2),
        cost_estimate=pl.CostEstimate(flops=int(b * nc_lit * hw),
                                      transcendentals=0,
                                      bytes_accessed=bytes2),
    )(up3d, inner_r)

    light = preds[:, 0:num_dir]
    glight = preds[:, num_dir:2 * num_dir]
    tmp = preds[:, 2 * num_dir:2 * num_dir + num_tmp]
    gtmp = preds[:, 2 * num_dir + num_tmp:n_preds]
    return out_inner.reshape(b, c, h, w), light, glight, tmp, gtmp


def ref_forward(inner_feat, guide_feat, params, nc_dir, nc_tmp):
    """Pure-JAX reference mirroring the PyTorch forward."""
    (w_pd1, w_pd2, w_pt1, w_pt2, w_qd1, w_qd2, w_qt1, w_qt2, alphas) = params
    a_pd, a_pt, a_qd, a_qt = (alphas[0], alphas[1], alphas[2], alphas[3])

    def prelu(x, a):
        return jnp.where(x >= 0, x, a * x)

    def fc(x, wt):  # x: (b, cin), wt: (cout, cin)
        return x @ wt.T

    feat_dir = inner_feat[:, :nc_dir].mean(axis=(2, 3))
    gfeat_dir = guide_feat[:, :nc_dir].mean(axis=(2, 3))
    feat_tmp = inner_feat[:, nc_dir:nc_dir + nc_tmp].mean(axis=(2, 3))
    gfeat_tmp = guide_feat[:, nc_dir:nc_dir + nc_tmp].mean(axis=(2, 3))

    light = fc(prelu(fc(feat_dir, w_pd1), a_pd), w_pd2)
    glight = fc(prelu(fc(gfeat_dir, w_pd1), a_pd), w_pd2)
    tmp = fc(prelu(fc(feat_tmp, w_pt1), a_pt), w_pt2)
    gtmp = fc(prelu(fc(gfeat_tmp, w_pt1), a_pt), w_pt2)

    up_dir = jnp.maximum(fc(prelu(fc(glight, w_qd1), a_qd), w_qd2), 0.0)
    up_tmp = jnp.maximum(fc(prelu(fc(gtmp, w_qt1), a_qt), w_qt2), 0.0)

    b, c, h, w = inner_feat.shape
    out = inner_feat
    out = out.at[:, :nc_dir].set(
        jnp.broadcast_to(up_dir[:, :, None, None], (b, nc_dir, h, w)))
    out = out.at[:, nc_dir:nc_dir + nc_tmp].set(
        jnp.broadcast_to(up_tmp[:, :, None, None], (b, nc_tmp, h, w)))
    return out, light, glight, tmp, gtmp


if __name__ == "__main__":
    # module hyper-params (small, deterministic)
    ncDir, ncTmp, numDir, numTmp, ncMiddle = 8, 8, 16, 8, 32
    extra_ch = 4                       # innerFeat has more channels than ncDir+ncTmp
    B = 2
    C = ncDir + ncTmp + extra_ch

    key = jax.random.PRNGKey(0)
    keys = jax.random.split(key, 12)

    def init_w(k, shape):
        return (0.1 * jax.random.normal(k, shape)).astype(jnp.float32)

    w_pd1 = init_w(keys[0], (ncMiddle, ncDir))   # predict_dir_FC1
    w_pd2 = init_w(keys[1], (numDir, ncMiddle))  # predict_dir_FC2
    w_pt1 = init_w(keys[2], (ncMiddle, ncTmp))   # predict_tmp_FC1
    w_pt2 = init_w(keys[3], (numTmp, ncMiddle))  # predict_tmp_FC2
    w_qd1 = init_w(keys[4], (ncMiddle, numDir))  # post_dir_FC1
    w_qd2 = init_w(keys[5], (ncDir, ncMiddle))   # post_dir_FC2
    w_qt1 = init_w(keys[6], (ncMiddle, numTmp))  # post_tmp_FC1
    w_qt2 = init_w(keys[7], (ncTmp, ncMiddle))   # post_tmp_FC2
    alphas = jnp.full((4,), 0.25, dtype=jnp.float32)  # nn.PReLU default init
    params = (w_pd1, w_pd2, w_pt1, w_pt2, w_qd1, w_qd2, w_qt1, w_qt2, alphas)

    fwd = jax.jit(lighting_net_forward, donate_argnums=0,
                  static_argnames=("tile_hw", "batch_tile"))

    # --- test 1: lane-dense 16x16 image, auto tiles (single hw tile, one
    #     batch element per grid step -> 2 parallel blocks / 2 TCs) ----------
    H1 = W1 = 16
    inner1 = jax.random.normal(keys[8], (B, C, H1, W1), dtype=jnp.float32)
    guide1 = jax.random.normal(keys[9], (B, C, H1, W1), dtype=jnp.float32)
    # reference BEFORE the kernel: innerFeat is donated (in-place, as in PyTorch)
    ref1 = jax.block_until_ready(ref_forward(inner1, guide1, params, ncDir, ncTmp))
    out1 = jax.block_until_ready(fwd(inner1, guide1, params))
    for o, r in zip(out1, ref1):
        np.testing.assert_allclose(np.asarray(o), np.asarray(r),
                                   rtol=1e-4, atol=1e-5)

    # --- test 2: forced H*W tiling with a ragged last tile (18*18 = 324 with
    #     tile_hw=128 -> 3 hw tiles, masked edge) and batch folding (bt=2) ---
    H2 = W2 = 18
    inner2 = jax.random.normal(keys[10], (B, C, H2, W2), dtype=jnp.float32)
    guide2 = jax.random.normal(keys[11], (B, C, H2, W2), dtype=jnp.float32)
    ref2 = jax.block_until_ready(ref_forward(inner2, guide2, params, ncDir, ncTmp))
    out2 = jax.block_until_ready(fwd(inner2, guide2, params, tile_hw=128))
    for o, r in zip(out2, ref2):
        np.testing.assert_allclose(np.asarray(o), np.asarray(r),
                                   rtol=1e-4, atol=1e-5)

    print("KERNEL_OK")
</pallas_src>

<mosaic_0001>
module attributes {stable_mosaic.version = 11 : i64} {
  func.func @broadcast_kernel(%arg0: i32, %arg1: i32, %arg2: memref<1x16x1xf32, #tpu.memory_space<vmem>>, %arg3: memref<2x20x256xf32, #tpu.memory_space<any>>, %arg4: memref<1x16x256xf32, #tpu.memory_space<vmem>>) attributes {dimension_semantics = [#tpu.dimension_semantics<parallel>, #tpu.dimension_semantics<parallel>], iteration_bounds = array<i64: 2, 1>, scalar_prefetch = 0 : i64, scratch_operands = 0 : i64, tpu.core_type = #tpu.core_type<tc>, window_params = [{transform_indices = @transform_0, window_bounds = array<i64: 1, 16, 1>}, {}, {transform_indices = @transform_2, window_bounds = array<i64: 1, 16, 256>}]} {
    %c0 = arith.constant 0 : index
    %c0_0 = arith.constant 0 : index
    %c0_1 = arith.constant 0 : index
    %0 = vector.load %arg2[%c0, %c0_0, %c0_1] : memref<1x16x1xf32, #tpu.memory_space<vmem>>, vector<1x16x1xf32>
    %1 = vector.shape_cast %0 : vector<1x16x1xf32> to vector<1x16x1xf32>
    %2 = vector.broadcast %1 : vector<1x16x1xf32> to vector<1x16x256xf32>
    %c0_2 = arith.constant 0 : index
    %c0_3 = arith.constant 0 : index
    %c0_4 = arith.constant 0 : index
    %3 = vector.load %arg4[%c0_2, %c0_3, %c0_4] : memref<1x16x256xf32, #tpu.memory_space<vmem>>, vector<1x16x256xf32>
    tpu.vector_store %arg4[%c0_2, %c0_3, %c0_4], %2 {strides = array<i32>} : memref<1x16x256xf32, #tpu.memory_space<vmem>>, vector<1x16x256xf32>,
    return
  }
  func.func @transform_0(%arg0: i32, %arg1: i32) -> (i32, i32, i32) {
    %c0_i32 = arith.constant 0 : i32
    %c0_i32_0 = arith.constant 0 : i32
    %c0_i32_1 = arith.constant 0 : i32
    return %arg0, %c0_i32, %c0_i32_0 : i32, i32, i32
  }
  func.func @transform_2(%arg0: i32, %arg1: i32) -> (i32, i32, i32) {
    %c0_i32 = arith.constant 0 : i32
    %c0_i32_0 = arith.constant 0 : i32
    return %arg0, %c0_i32, %arg1 : i32, i32, i32
  }
}

module attributes {stable_mosaic.version = 11 : i64} {
  func.func @reduce_kernel(%arg0: i32, %arg1: i32, %arg2: memref<4xf32, #tpu.memory_space<smem>>, %arg3: memref<1x16x256xf32, #tpu.memory_space<vmem>>, %arg4: memref<1x16x256xf32, #tpu.memory_space<vmem>>, %arg5: memref<8x32xf32, #tpu.memory_space<vmem>>, %arg6: memref<32x16xf32, #tpu.memory_space<vmem>>, %arg7: memref<8x32xf32, #tpu.memory_space<vmem>>, %arg8: memref<32x8xf32, #tpu.memory_space<vmem>>, %arg9: memref<16x32xf32, #tpu.memory_space<vmem>>, %arg10: memref<32x8xf32, #tpu.memory_space<vmem>>, %arg11: memref<8x32xf32, #tpu.memory_space<vmem>>, %arg12: memref<32x8xf32, #tpu.memory_space<vmem>>, %arg13: memref<1x1x48xf32, #tpu.memory_space<vmem>>, %arg14: memref<1x1x16xf32, #tpu.memory_space<vmem>>, %arg15: memref<1x16xf32, #tpu.memory_space<vmem>>, %arg16: memref<1x16xf32, #tpu.memory_space<vmem>>) attributes {dimension_semantics = [#tpu.dimension_semantics<parallel>, #tpu.dimension_semantics<arbitrary>], iteration_bounds = array<i64: 2, 1>, scalar_prefetch = 0 : i64, scratch_operands = 2 : i64, tpu.core_type = #tpu.core_type<tc>, window_params = [{transform_indices = @transform_0, window_bounds = array<i64: 4>}, {transform_indices = @transform_1, window_bounds = array<i64: 1, 16, 256>}, {transform_indices = @transform_2, window_bounds = array<i64: 1, 16, 256>}, {pipeline_mode = #tpu.pipeline_mode<synchronous>, transform_indices = @transform_3, window_bounds = array<i64: 8, 32>}, {pipeline_mode = #tpu.pipeline_mode<synchronous>, transform_indices = @transform_4, window_bounds = array<i64: 32, 16>}, {pipeline_mode = #tpu.pipeline_mode<synchronous>, transform_indices = @transform_5, window_bounds = array<i64: 8, 32>}, {pipeline_mode = #tpu.pipeline_mode<synchronous>, transform_indices = @transform_6, window_bounds = array<i64: 32, 8>}, {pipeline_mode = #tpu.pipeline_mode<synchronous>, transform_indices = @transform_7, window_bounds = array<i64: 16, 32>}, {pipeline_mode = #tpu.pipeline_mode<synchronous>, transform_indices = @transform_8, window_bounds = array<i64: 32, 8>}, {pipeline_mode = #tpu.pipeline_mode<synchronous>, transform_indices = @transform_9, window_bounds = array<i64: 8, 32>}, {pipeline_mode = #tpu.pipeline_mode<synchronous>, transform_indices = @transform_10, window_bounds = array<i64: 32, 8>}, {transform_indices = @transform_11, window_bounds = array<i64: 1, 1, 48>}, {transform_indices = @transform_12, window_bounds = array<i64: 1, 1, 16>}]} {
    %c0_i32 = arith.constant 0 : i32
    %0 = arith.cmpi eq, %arg1, %c0_i32 : i32
    %1 = arith.extui %0 : i1 to i32
    %c0_i32_0 = arith.constant 0 : i32
    %2 = arith.cmpi ne, %1, %c0_i32_0 : i32
    scf.if %2 {
      %cst_17 = arith.constant 0.000000e+00 : f32
      %16 = vector.broadcast %cst_17 : f32 to vector<1x16xf32>
      %c0_18 = arith.constant 0 : index
      %c0_19 = arith.constant 0 : index
      %17 = vector.load %arg15[%c0_18, %c0_19] : memref<1x16xf32, #tpu.memory_space<vmem>>, vector<1x16xf32>
      tpu.vector_store %arg15[%c0_18, %c0_19], %16 {strides = array<i32>} : memref<1x16xf32, #tpu.memory_space<vmem>>, vector<1x16xf32>,
      %cst_20 = arith.constant 0.000000e+00 : f32
      %18 = vector.broadcast %cst_20 : f32 to vector<1x16xf32>
      %c0_21 = arith.constant 0 : index
      %c0_22 = arith.constant 0 : index
      %19 = vector.load %arg16[%c0_21, %c0_22] : memref<1x16xf32, #tpu.memory_space<vmem>>, vector<1x16xf32>
      tpu.vector_store %arg16[%c0_21, %c0_22], %18 {strides = array<i32>} : memref<1x16xf32, #tpu.memory_space<vmem>>, vector<1x16xf32>,
    } else {
    }
    %c0 = arith.constant 0 : index
    %c0_1 = arith.constant 0 : index
    %c0_2 = arith.constant 0 : index
    %3 = vector.load %arg3[%c0, %c0_1, %c0_2] : memref<1x16x256xf32, #tpu.memory_space<vmem>>, vector<1x16x256xf32>
    %c0_3 = arith.constant 0 : index
    %c0_4 = arith.constant 0 : index
    %c0_5 = arith.constant 0 : index
    %4 = vector.load %arg4[%c0_3, %c0_4, %c0_5] : memref<1x16x256xf32, #tpu.memory_space<vmem>>, vector<1x16x256xf32>
    %c0_6 = arith.constant 0 : index
    %c0_7 = arith.constant 0 : index
    %5 = vector.load %arg15[%c0_6, %c0_7] : memref<1x16xf32, #tpu.memory_space<vmem>>, vector<1x16xf32>
    %cst = arith.constant dense<0.000000e+00> : vector<1x16xf32>
    %6 = vector.multi_reduction <add>, %3, %cst [2] : vector<1x16x256xf32> to vector<1x16xf32>
    %7 = arith.addf %5, %6 : vector<1x16xf32>
    %c0_8 = arith.constant 0 : index
    %c0_9 = arith.constant 0 : index
    %8 = vector.load %arg15[%c0_8, %c0_9] : memref<1x16xf32, #tpu.memory_space<vmem>>, vector<1x16xf32>
    tpu.vector_store %arg15[%c0_8, %c0_9], %7 {strides = array<i32>} : memref<1x16xf32, #tpu.memory_space<vmem>>, vector<1x16xf32>,
    %c0_10 = arith.constant 0 : index
    %c0_11 = arith.constant 0 : index
    %9 = vector.load %arg16[%c0_10, %c0_11] : memref<1x16xf32, #tpu.memory_space<vmem>>, vector<1x16xf32>
    %cst_12 = arith.constant dense<0.000000e+00> : vector<1x16xf32>
    %10 = vector.multi_reduction <add>, %4, %cst_12 [2] : vector<1x16x256xf32> to vector<1x16xf32>
    %11 = arith.addf %9, %10 : vector<1x16xf32>
    %c0_13 = arith.constant 0 : index
    %c0_14 = arith.constant 0 : index
    %12 = vector.load %arg16[%c0_13, %c0_14] : memref<1x16xf32, #tpu.memory_space<vmem>>, vector<1x16xf32>
    tpu.vector_store %arg16[%c0_13, %c0_14], %11 {strides = array<i32>} : memref<1x16xf32, #tpu.memory_space<vmem>>, vector<1x16xf32>,
    %c0_i32_15 = arith.constant 0 : i32
    %13 = arith.cmpi eq, %arg1, %c0_i32_15 : i32
    %14 = arith.extui %13 : i1 to i32
    %c0_i32_16 = arith.constant 0 : i32
    %15 = arith.cmpi ne, %14, %c0_i32_16 : i32
    scf.if %15 {
      %c0_17 = arith.constant 0 : index
      %16 = memref.load %arg2[%c0_17] : memref<4xf32, #tpu.memory_space<smem>>
      %c1 = arith.constant 1 : index
      %17 = memref.load %arg2[%c1] : memref<4xf32, #tpu.memory_space<smem>>
      %c2 = arith.constant 2 : index
      %18 = memref.load %arg2[%c2] : memref<4xf32, #tpu.memory_space<smem>>
      %c3 = arith.constant 3 : index
      %19 = memref.load %arg2[%c3] : memref<4xf32, #tpu.memory_space<smem>>
      %c0_18 = arith.constant 0 : index
      %c0_19 = arith.constant 0 : index
      %20 = vector.load %arg15[%c0_18, %c0_19] : memref<1x16xf32, #tpu.memory_space<vmem>>, vector<1x16xf32>
      %c0_20 = arith.constant 0 : index
      %c0_21 = arith.constant 0 : index
      %21 = vector.load %arg16[%c0_20, %c0_21] : memref<1x16xf32, #tpu.memory_space<vmem>>, vector<1x16xf32>
      %22 = tpu.concatenate %20, %21 in 0 : vector<1x16xf32>, vector<1x16xf32> -> vector<2x16xf32>
      %cst_22 = arith.constant 3.906250e-03 : f32
      %23 = vector.broadcast %cst_22 : f32 to vector<2x16xf32>
      %24 = arith.mulf %22, %23 : vector<2x16xf32>
      %25 = vector.extract_strided_slice %24 {offsets = [0, 0], sizes = [2, 8], strides = [1, 1]} : vector<2x16xf32> to vector<2x8xf32>
      %c0_23 = arith.constant 0 : index
      %c0_24 = arith.constant 0 : index
      %26 = vector.load %arg5[%c0_23, %c0_24] : memref<8x32xf32, #tpu.memory_space<vmem>>, vector<8x32xf32>
      %c0_25 = arith.constant 0 : index
      %c0_26 = arith.constant 0 : index
      %27 = vector.load %arg6[%c0_25, %c0_26] : memref<32x16xf32, #tpu.memory_space<vmem>>, vector<32x16xf32>
      %cst_27 = arith.constant dense<0.000000e+00> : vector<2x32xf32>
      %28 = tpu.matmul %25, %26, %cst_27 {dimension_numbers = #tpu.dot_dimension_numbers<[1], [0], [0], [1], [0, 0, 1, 1], [], []>} : vector<2x8xf32>, vector<8x32xf32>, vector<2x32xf32> -> vector<2x32xf32>
      %cst_28 = arith.constant 0.000000e+00 : f32
      %29 = vector.broadcast %cst_28 : f32 to vector<2x32xf32>
      %30 = arith.cmpf oge, %28, %29 : vector<2x32xf32>
      %31 = vector.broadcast %16 : f32 to vector<2x32xf32>
      %32 = arith.mulf %31, %28 : vector<2x32xf32>
      %33 = arith.select %30, %28, %32 : vector<2x32xi1>, vector<2x32xf32>
      %cst_29 = arith.constant dense<0.000000e+00> : vector<2x16xf32>
      %34 = tpu.matmul %33, %27, %cst_29 {dimension_numbers = #tpu.dot_dimension_numbers<[1], [0], [0], [1], [0, 0, 1, 1], [], []>} : vector<2x32xf32>, vector<32x16xf32>, vector<2x16xf32> -> vector<2x16xf32>
      %35 = vector.extract_strided_slice %24 {offsets = [0, 8], sizes = [2, 8], strides = [1, 1]} : vector<2x16xf32> to vector<2x8xf32>
      %c0_30 = arith.constant 0 : index
      %c0_31 = arith.constant 0 : index
      %36 = vector.load %arg7[%c0_30, %c0_31] : memref<8x32xf32, #tpu.memory_space<vmem>>, vector<8x32xf32>
      %c0_32 = arith.constant 0 : index
      %c0_33 = arith.constant 0 : index
      %37 = vector.load %arg8[%c0_32, %c0_33] : memref<32x8xf32, #tpu.memory_space<vmem>>, vector<32x8xf32>
      %cst_34 = arith.constant dense<0.000000e+00> : vector<2x32xf32>
      %38 = tpu.matmul %35, %36, %cst_34 {dimension_numbers = #tpu.dot_dimension_numbers<[1], [0], [0], [1], [0, 0, 1, 1], [], []>} : vector<2x8xf32>, vector<8x32xf32>, vector<2x32xf32> -> vector<2x32xf32>
      %cst_35 = arith.constant 0.000000e+00 : f32
      %39 = vector.broadcast %cst_35 : f32 to vector<2x32xf32>
      %40 = arith.cmpf oge, %38, %39 : vector<2x32xf32>
      %41 = vector.broadcast %17 : f32 to vector<2x32xf32>
      %42 = arith.mulf %41, %38 : vector<2x32xf32>
      %43 = arith.select %40, %38, %42 : vector<2x32xi1>, vector<2x32xf32>
      %cst_36 = arith.constant dense<0.000000e+00> : vector<2x8xf32>
      %44 = tpu.matmul %43, %37, %cst_36 {dimension_numbers = #tpu.dot_dimension_numbers<[1], [0], [0], [1], [0, 0, 1, 1], [], []>} : vector<2x32xf32>, vector<32x8xf32>, vector<2x8xf32> -> vector<2x8xf32>
      %45 = vector.extract_strided_slice %34 {offsets = [1, 0], sizes = [1, 16], strides = [1, 1]} : vector<2x16xf32> to vector<1x16xf32>
      %c0_37 = arith.constant 0 : index
      %c0_38 = arith.constant 0 : index
      %46 = vector.load %arg9[%c0_37, %c0_38] : memref<16x32xf32, #tpu.memory_space<vmem>>, vector<16x32xf32>
      %c0_39 = arith.constant 0 : index
      %c0_40 = arith.constant 0 : index
      %47 = vector.load %arg10[%c0_39, %c0_40] : memref<32x8xf32, #tpu.memory_space<vmem>>, vector<32x8xf32>
      %cst_41 = arith.constant dense<0.000000e+00> : vector<1x32xf32>
      %48 = tpu.matmul %45, %46, %cst_41 {dimension_numbers = #tpu.dot_dimension_numbers<[1], [0], [0], [1], [0, 0, 1, 1], [], []>} : vector<1x16xf32>, vector<16x32xf32>, vector<1x32xf32> -> vector<1x32xf32>
      %cst_42 = arith.constant 0.000000e+00 : f32
      %49 = vector.broadcast %cst_42 : f32 to vector<1x32xf32>
      %50 = arith.cmpf oge, %48, %49 : vector<1x32xf32>
      %51 = vector.broadcast %18 : f32 to vector<1x32xf32>
      %52 = arith.mulf %51, %48 : vector<1x32xf32>
      %53 = arith.select %50, %48, %52 : vector<1x32xi1>, vector<1x32xf32>
      %cst_43 = arith.constant dense<0.000000e+00> : vector<1x8xf32>
      %54 = tpu.matmul %53, %47, %cst_43 {dimension_numbers = #tpu.dot_dimension_numbers<[1], [0], [0], [1], [0, 0, 1, 1], [], []>} : vector<1x32xf32>, vector<32x8xf32>, vector<1x8xf32> -> vector<1x8xf32>
      %cst_44 = arith.constant 0.000000e+00 : f32
      %55 = vector.broadcast %cst_44 : f32 to vector<1x8xf32>
      %56 = arith.maximumf %54, %55 : vector<1x8xf32>
      %57 = vector.extract_strided_slice %44 {offsets = [1, 0], sizes = [1, 8], strides = [1, 1]} : vector<2x8xf32> to vector<1x8xf32>
      %c0_45 = arith.constant 0 : index
      %c0_46 = arith.constant 0 : index
      %58 = vector.load %arg11[%c0_45, %c0_46] : memref<8x32xf32, #tpu.memory_space<vmem>>, vector<8x32xf32>
      %c0_47 = arith.constant 0 : index
      %c0_48 = arith.constant 0 : index
      %59 = vector.load %arg12[%c0_47, %c0_48] : memref<32x8xf32, #tpu.memory_space<vmem>>, vector<32x8xf32>
      %cst_49 = arith.constant dense<0.000000e+00> : vector<1x32xf32>
      %60 = tpu.matmul %57, %58, %cst_49 {dimension_numbers = #tpu.dot_dimension_numbers<[1], [0], [0], [1], [0, 0, 1, 1], [], []>} : vector<1x8xf32>, vector<8x32xf32>, vector<1x32xf32> -> vector<1x32xf32>
      %cst_50 = arith.constant 0.000000e+00 : f32
      %61 = vector.broadcast %cst_50 : f32 to vector<1x32xf32>
      %62 = arith.cmpf oge, %60, %61 : vector<1x32xf32>
      %63 = vector.broadcast %19 : f32 to vector<1x32xf32>
      %64 = arith.mulf %63, %60 : vector<1x32xf32>
      %65 = arith.select %62, %60, %64 : vector<1x32xi1>, vector<1x32xf32>
      %cst_51 = arith.constant dense<0.000000e+00> : vector<1x8xf32>
      %66 = tpu.matmul %65, %59, %cst_51 {dimension_numbers = #tpu.dot_dimension_numbers<[1], [0], [0], [1], [0, 0, 1, 1], [], []>} : vector<1x32xf32>, vector<32x8xf32>, vector<1x8xf32> -> vector<1x8xf32>
      %cst_52 = arith.constant 0.000000e+00 : f32
      %67 = vector.broadcast %cst_52 : f32 to vector<1x8xf32>
      %68 = arith.maximumf %66, %67 : vector<1x8xf32>
      %69 = vector.extract_strided_slice %34 {offsets = [0, 0], sizes = [1, 16], strides = [1, 1]} : vector<2x16xf32> to vector<1x16xf32>
      %70 = vector.extract_strided_slice %34 {offsets = [1, 0], sizes = [1, 16], strides = [1, 1]} : vector<2x16xf32> to vector<1x16xf32>
      %71 = vector.extract_strided_slice %44 {offsets = [0, 0], sizes = [1, 8], strides = [1, 1]} : vector<2x8xf32> to vector<1x8xf32>
      %72 = vector.extract_strided_slice %44 {offsets = [1, 0], sizes = [1, 8], strides = [1, 1]} : vector<2x8xf32> to vector<1x8xf32>
      %73 = tpu.concatenate %69, %70, %71, %72 in 1 : vector<1x16xf32>, vector<1x16xf32>, vector<1x8xf32>, vector<1x8xf32> -> vector<1x48xf32>
      %c0_53 = arith.constant 0 : index
      %c0_54 = arith.constant 0 : index
      %c0_55 = arith.constant 0 : index
      %74 = vector.load %arg13[%c0_53, %c0_54, %c0_55] : memref<1x1x48xf32, #tpu.memory_space<vmem>>, vector<1x1x48xf32>
      %75 = vector.shape_cast %74 : vector<1x1x48xf32> to vector<1x48xf32>
      %76 = vector.shape_cast %73 : vector<1x48xf32> to vector<1x1x48xf32>
      tpu.vector_store %arg13[%c0_53, %c0_54, %c0_55], %76 {strides = array<i32>} : memref<1x1x48xf32, #tpu.memory_space<vmem>>, vector<1x1x48xf32>,
      %77 = tpu.concatenate %56, %68 in 1 : vector<1x8xf32>, vector<1x8xf32> -> vector<1x16xf32>
      %c0_56 = arith.constant 0 : index
      %c0_57 = arith.constant 0 : index
      %c0_58 = arith.constant 0 : index
      %78 = vector.load %arg14[%c0_56, %c0_57, %c0_58] : memref<1x1x16xf32, #tpu.memory_space<vmem>>, vector<1x1x16xf32>
      %79 = vector.shape_cast %78 : vector<1x1x16xf32> to vector<1x16xf32>
      %80 = vector.shape_cast %77 : vector<1x16xf32> to vector<1x1x16xf32>
      tpu.vector_store %arg14[%c0_56, %c0_57, %c0_58], %80 {strides = array<i32>} : memref<1x1x16xf32, #tpu.memory_space<vmem>>, vector<1x1x16xf32>,
    } else {
    }
    return
  }
  func.func @transform_0(%arg0: i32, %arg1: i32) -> i32 {
    %c0_i32 = arith.constant 0 : i32
    %c0_i32_0 = arith.constant 0 : i32
    return %c0_i32 : i32
  }
  func.func @transform_1(%arg0: i32, %arg1: i32) -> (i32, i32, i32) {
    %c0_i32 = arith.constant 0 : i32
    %c0_i32_0 = arith.constant 0 : i32
    return %arg0, %c0_i32, %arg1 : i32, i32, i32
  }
  func.func @transform_2(%arg0: i32, %arg1: i32) -> (i32, i32, i32) {
    %c0_i32 = arith.constant 0 : i32
    %c0_i32_0 = arith.constant 0 : i32
    return %arg0, %c0_i32, %arg1 : i32, i32, i32
  }
  func.func @transform_3(%arg0: i32, %arg1: i32) -> (i32, i32) {
    %c0_i32 = arith.constant 0 : i32
    %c0_i32_0 = arith.constant 0 : i32
    %c0_i32_1 = arith.constant 0 : i32
    return %c0_i32, %c0_i32_0 : i32, i32
  }
  func.func @transform_4(%arg0: i32, %arg1: i32) -> (i32, i32) {
    %c0_i32 = arith.constant 0 : i32
    %c0_i32_0 = arith.constant 0 : i32
    %c0_i32_1 = arith.constant 0 : i32
    return %c0_i32, %c0_i32_0 : i32, i32
  }
  func.func @transform_5(%arg0: i32, %arg1: i32) -> (i32, i32) {
    %c0_i32 = arith.constant 0 : i32
    %c0_i32_0 = arith.constant 0 : i32
    %c0_i32_1 = arith.constant 0 : i32
    return %c0_i32, %c0_i32_0 : i32, i32
  }
  func.func @transform_6(%arg0: i32, %arg1: i32) -> (i32, i32) {
    %c0_i32 = arith.constant 0 : i32
    %c0_i32_0 = arith.constant 0 : i32
    %c0_i32_1 = arith.constant 0 : i32
    return %c0_i32, %c0_i32_0 : i32, i32
  }
  func.func @transform_7(%arg0: i32, %arg1: i32) -> (i32, i32) {
    %c0_i32 = arith.constant 0 : i32
    %c0_i32_0 = arith.constant 0 : i32
    %c0_i32_1 = arith.constant 0 : i32
    return %c0_i32, %c0_i32_0 : i32, i32
  }
  func.func @transform_8(%arg0: i32, %arg1: i32) -> (i32, i32) {
    %c0_i32 = arith.constant 0 : i32
    %c0_i32_0 = arith.constant 0 : i32
    %c0_i32_1 = arith.constant 0 : i32
    return %c0_i32, %c0_i32_0 : i32, i32
  }
  func.func @transform_9(%arg0: i32, %arg1: i32) -> (i32, i32) {
    %c0_i32 = arith.constant 0 : i32
    %c0_i32_0 = arith.constant 0 : i32
    %c0_i32_1 = arith.constant 0 : i32
    return %c0_i32, %c0_i32_0 : i32, i32
  }
  func.func @transform_10(%arg0: i32, %arg1: i32) -> (i32, i32) {
    %c0_i32 = arith.constant 0 : i32
    %c0_i32_0 = arith.constant 0 : i32
    %c0_i32_1 = arith.constant 0 : i32
    return %c0_i32, %c0_i32_0 : i32, i32
  }
  func.func @transform_11(%arg0: i32, %arg1: i32) -> (i32, i32, i32) {
    %c0_i32 = arith.constant 0 : i32
    %c0_i32_0 = arith.constant 0 : i32
    %c0_i32_1 = arith.constant 0 : i32
    return %arg0, %c0_i32, %c0_i32_0 : i32, i32, i32
  }
  func.func @transform_12(%arg0: i32, %arg1: i32) -> (i32, i32, i32) {
    %c0_i32 = arith.constant 0 : i32
    %c0_i32_0 = arith.constant 0 : i32
    %c0_i32_1 = arith.constant 0 : i32
    return %arg0, %c0_i32, %c0_i32_0 : i32, i32, i32
  }
}

</mosaic_0001>

<bundles_post_ra>
// kernel: lighting_net_forward.3
= control target key start
LH: loop header
LB: loop body
LE: loop exit
PB: predicated region body
PF: predicated region fallthrough
CT: control target
= control target key end

     0   :  { %s352_s9 = smov 0   ;;  %s354_s10 = smov 0   ;;  %s422_s0 = inlined_call_operand.vmem [shape: f32[2,16,1], index: 0, kind: input, shape index: {}]   ;;  %s423_s1 = inlined_call_operand.vmem [shape: f32[2,20,256], index: 1, kind: input, shape index: {}, may-alias: {1,2}]   ;;  %s424_s2 = inlined_call_operand.vmem [shape: f32[2,20,256], index: 2, kind: output, shape index: {}, may-alias: {1,2}]  }
   0x1   :  { %s356_s11 = smov 0   ;;  %s358_s12 = smov 0  }
   0x2   :  { %s360_s13 = smov 0  }
   0x3 LB: > { %s240_s1 = sadd.s32 4294967295, %s334_s13   ;;  %s24_s14 = sadd.s32 1, %s330_s12  ;;  %s334_s13 = sphi %s360_s13, %s12_s13   ;;  %s330_s12 = sphi %s358_s12, %s429_s12   ;;  %s326_s11 = sphi %s356_s11, %s428_s11   ;;  %s322_s10 = sphi %s354_s10, %s427_s10   ;;  %s318_s9 = sphi %s352_s9, %s426_s9  }
   0x4   : > { %p26_p0 = scmp.ge.s32.totalorder %s24_s14, 2  ;;  %s59_s15 = sadd.s32 1, %s322_s10 }
   0x5   : > { %p69_p1 = scmp.ne.s32.totalorder %s322_s10, %s318_s9  ;;  %p70_p2 = scmp.eq.s32.totalorder %s240_s1, 1 }
   0x6   : > { %s431_s14 = smov (%p26_p0, %s24_s14), 0  ;;  %p244_p4 = scmp.ge.s32.totalorder %s334_s13, 1 }
   0x7   : > { %p384_p3 = por %p70_p2, %p69_p1  ;;  %s54_s17 = ssub.s32 %s330_s12, %s431_s14 }
   0x8   : > { %p102_p5 = scmp.lt.s32.totalorder %s334_s13, 3  ;;  %p57_p6 = scmp.eq.s32.totalorder %s54_s17, 0 }
   0xa   : > { %p103_p7 = pnand %p244_p4, %p102_p5 }
   0xb   : > { %s393_s18 = scalar_select %p57_p6, %s322_s10, %s59_s15  }
   0xc   : > { %106 = sbr.rel (%p103_p7) target bundleno = 165 (0xa5), region = 24  ;;  %p121_p8 = scmp.lt.s32.totalorder (!%p103_p7), %s326_s11, 1  ;;  %v336_v0 = vmov (!%p103_p7), 0  }
   0xd   : > { %295 = vset.pattern.permute.xlu0 (!%p103_p7), %v336_v0  ;;  %s118_s24 = sand.u32 (!%p103_p7), 1, %s318_s9  }
   0xe   : > { %s245_s25 = sshll.u32 (!%p103_p7), %s118_s24, 5 }
   0xf   : > { %s120_s26 = scalar_lea.vmem (!%p103_p7), [#allocation2], %s245_s25 }
  0x13   : > { %s122_s19 = scalar_select %p121_p8, %s326_s11, 1 }
  0x14   : > { %s253_s27 = smul.u32 (%p384_p3), 48, %s326_s11 }
  0x15   : > { %s252_s20 = sshll.u32 %s122_s19, 4 }
  0x16   : > { %s125_s23 = scalar_lea.vmem %s422_s0, %s252_s20  ;;  %s154_s30 = scalar_lea.vmem (%p384_p3), %s424_s2, %s253_s27 }
  0x17   : > { %v127_v1 = vld [vmem:[%s125_s23] sm:$0xff]  ;;  %v128_v2 = vld [vmem:[%s125_s23 + $0x8] sm:$0xff] }
  0x18   : > { %131 = vperm.xlu0 %295, %v127_v1  }
  0x1c   : > { %136 = vperm.xlu0 %295, %v128_v2  }
  0x96   : > { %149 = sbr.rel (!%p384_p3) target bundleno = 165 (0xa5), region = 28 }
  0x97   : > { %v132_v3 = vpop.permute.xlu0 %131 }
  0x98   : > { %139 = vst [vmem:[%s120_s26] sm:$0xff] %v132_v3  ;;  %140 = vst [vmem:[%s120_s26 + $0x8] sm:$0xff] %v132_v3 }
  0x9b   : > { %v137_v4 = vpop.permute.xlu0 %136 }
  0x9c   : > { %141 = vst [vmem:[%s120_s26 + $0x10] sm:$0xff] %v137_v4  ;;  %142 = vst [vmem:[%s120_s26 + $0x18] sm:$0xff] %v137_v4 }
  0x9f   : > { %v167_v5 = vld [vmem:[%s120_s26] sm:$0xff]  ;;  %v169_v6 = vld [vmem:[%s120_s26 + $0x8] sm:$0xff] }
  0xa0   : > { %168 = vst [vmem:[%s154_s30] sm:$0xff] %v167_v5  ;;  %170 = vst [vmem:[%s154_s30 + $0x8] sm:$0xff] %v169_v6 }
  0xa3   : > { %v171_v7 = vld [vmem:[%s120_s26 + $0x10] sm:$0xff]  ;;  %v173_v8 = vld [vmem:[%s120_s26 + $0x18] sm:$0xff] }
  0xa4   : > { %172 = vst [vmem:[%s154_s30 + $0x10] sm:$0xff] %v171_v7  ;;  %174 = vst [vmem:[%s154_s30 + $0x18] sm:$0xff] %v173_v8 }
  0xa5 PF: > { %s12_s13 = sadd.s32 1, %s334_s13   ;;  %s426_s9 = smov %s322_s10 }
  0xa6   : > { %p9_p9 = scmp.ge.s32.totalorder %s12_s13, 4   ;;  %s427_s10 = smov %s393_s18 }
  0xa7   : > { %s428_s11 = smov %s330_s12  ;;  %s429_s12 = smov %s431_s14 }
  0xa8   :  { %11 = sbr.rel (!%p9_p9) target bundleno = 3 (0x3), region = 77 }

// kernel: lighting_net_forward.2
= control target key start
LH: loop header
LB: loop body
LE: loop exit
PB: predicated region body
PF: predicated region fallthrough
CT: control target
= control target key end

     0   :  { %18 = vsyncpa [#allocation5], 0  ;;  %s2020_s21 = smov 0   ;;  %s2022_s22 = smov 0   ;;  %s2292_s0 = inlined_call_operand.vmem [shape: f32[4], index: 0, kind: input, shape index: {}]   ;;  %s2293_s1 = inlined_call_operand.vmem [shape: f32[2,20,256], index: 1, kind: input, shape index: {}]   ;;  %s2294_s2 = inlined_call_operand.vmem [shape: f32[2,20,256], index: 2, kind: input, shape index: {}]   ;;  %s2295_s3 = inlined_call_operand.vmem [shape: f32[8,32], index: 3, kind: input, shape index: {}]   ;;  %s2296_s4 = inlined_call_operand.vmem [shape: f32[32,16], index: 4, kind: input, shape index: {}]   ;;  %s2297_s5 = inlined_call_operand.vmem [shape: f32[8,32], index: 5, kind: input, shape index: {}]   ;;  %s2298_s6 = inlined_call_operand.vmem [shape: f32[32,8], index: 6, kind: input, shape index: {}]   ;;  %s2299_s7 = inlined_call_operand.vmem [shape: f32[16,32], index: 7, kind: input, shape index: {}]   ;;  %s2300_s8 = inlined_call_operand.vmem [shape: f32[32,8], index: 8, kind: input, shape index: {}]   ;;  %s2301_s9 = inlined_call_operand.vmem [shape: f32[8,32], index: 9, kind: input, shape index: {}]   ;;  %s2302_s10 = inlined_call_operand.vmem [shape: f32[32,8], index: 10, kind: input, shape index: {}]   ;;  %s2303_s11 = inlined_call_operand.vmem [shape: f32[2,1,48], index: 11, kind: output, shape index: {0}]   ;;  %s2304_s12 = inlined_call_operand.vmem [shape: f32[2,1,16], index: 12, kind: output, shape index: {1}]  }
   0x1   :  { %s2024_s23 = smov 0  }
   0x2 LB: > { %s1708_s24 = sadd.s32 4294967295, %s1942_s23   ;;  %s36_s25 = sadd.s32 1, %s1938_s22  ;;  %s1942_s23 = sphi %s2024_s23, %s24_s23   ;;  %s1938_s22 = sphi %s2022_s22, %s2308_s22   ;;  %s1934_s21 = sphi %s2020_s21, %s2307_s21  }
   0x3   : > { %p38_p0 = scmp.ge.s32.totalorder %s36_s25, 2  ;;  %p1710_p1 = scmp.ge.s32.totalorder %s1942_s23, 1 }
   0x4   : > { %p338_p2 = scmp.lt.s32.totalorder %s1942_s23, 3  ;;  %p2045_p4 = scmp.eq.s32.totalorder %s1708_s24, 0 }
   0x5   : > { %s2310_s25 = smov (%p38_p0, %s36_s25), 0  ;;  %s351_s30 = sshll.u32 %s2292_s0, 4  ;;  %s352_s30 = int_to_ptr.vmem [resolvable:$true] %s351_s30 }
   0x6   : > { %p2041_p3 = pnand %p1710_p1, %p338_p2  ;;  %s1901_s13 = scalar_lea.vmem %s352_s30, 16 }
   0x7   : > { %p1902_p7 = scmp.ne.s32.totalorder %s352_s30, %s1901_s13  ;;  %p1909_p11 = scmp.lt.s32.totalorder %s352_s30, %s352_s30 }
   0x8   : > { %p1858_p5 = pneg %p2041_p3  ;;  %p1910_p12 = scmp.lt.s32.totalorder %s1901_s13, %s1901_s13 }
   0xa   : > { %p1859_p6 = pnand %p2045_p4, %p1858_p5  ;;  %p1911_p13 = por %p1910_p12, %p1909_p11 }
   0xc   : > { %p1903_p8 = pneg %p1859_p6 }
   0xe   : > { %p1904_p9 = pnand %p1903_p8, %p1902_p7 }
  0x10   : > { %p1905_p10 = pneg %p1904_p9 }
  0x12   : > { %p1912_p0 = pnand %p1911_p13, %p1905_p10 }
  0x14   : > { %1915 = shalt.err (!%p1912_p0)
}
  0x15   : > { %s1944_s14 = smov [#allocation4]   ;;  %414 = sbr.rel (%p2041_p3) target bundleno = 1448 (0x5a8), region = 64 }
  0x16   : > { %1861 = dma.vmem_to_smem (!%p1859_p6), %s352_s30, 16, %s1944_s14, [#allocation5]  }
  0x1c   : > { %1929 = dma.done.wait (%p2045_p4), [#allocation5], 16  }
  0x1d   : > { %1931 = vsyncadd (%p2045_p4), [#allocation5], 4294967280 }
  0x1e   : > { %420 = sfence }
  0x1f   : > { %p472_p1 = scmp.lt.s32.totalorder %s1934_s21, 1  ;;  %v1945_v12 = vmov 0   ;;  %v521_v13 = vlaneseq  ;;  %v1946_v14 = vmov 1966171168   ;;  %vm501_vm0 = vcmask 122880   ;;  %s1950_s16 = smov 120  }
  0x20   : > { %1899 = vset.pattern.permute.xlu0 %v1945_v12  ;;  %1900 = vset.pattern.permute.xlu1 %v1945_v12  ;;  %v590_v15 = vunpack.c.l.s4 %v1946_v14  ;;  %vm1948_vm1 = vmmov 0   ;;  %vm700_vm2 = vcmask 130112   ;;  %vm938_vm3 = vcmask 1040384   ;;  %s1717_s20 = sld [smem:[#allocation4 + $0x1]]  ;;  %s1951_s13 = smov 16  }
  0x21   : > { %s2312_s21 = smov (!%p472_p1, %s1934_s21), 1  ;;  %v2074_v16 = vshrl.u32 %v521_v13, 7  ;;  %vm946_vm4 = vcmask 64512   ;;  %vm1024_vm6 = vcmask 261120   ;;  %vm1262_vm8 = vcmask 130048   ;;  %s1952_s26 = smov 32  }
  0x22   : > { %s1853_s15 = smul.u32 48, %s2312_s21  ;;  %v591_v17 = vunpack.c.0.s8 %v590_v15  ;;  %s1953_s27 = smov 40   ;;  %vm1581_vm10 = vcmask 326656   ;;  %vm1583_vm11 = vcmask 385024  }
  0x23   : > { %v2077_v18 = vsub.s32 0, %v2074_v16  ;;  %v2080_v19 = vsub.s32 1, %v2074_v16  ;;  %v2083_v20 = vsub.s32 2, %v2074_v16  ;;  %v2086_v21 = vsub.s32 3, %v2074_v16  ;;  %s1718_s14 = sld [smem:[#allocation4 + $0x2]]  ;;  %s493_s17 = scalar_lea.vmem %s2303_s11, %s2312_s21 }
  0x24   : > { %s479_s18 = scalar_lea.vmem %s2293_s1, %s1853_s15  ;;  %s489_s24 = scalar_lea.vmem %s2294_s2, %s1853_s15  ;;  %v2089_v22 = vsub.s32 4, %v2074_v16  ;;  %v2092_v23 = vsub.s32 5, %v2074_v16  ;;  %v2095_v24 = vsub.s32 6, %v2074_v16  ;;  %v2098_v25 = vsub.s32 7, %v2074_v16 }
  0x25   : > { %v504_v0 = vld [vmem:[%s479_s18] sm:$0xff]  ;;  %v505_v1 = vld [vmem:[%s479_s18 + $0x8] sm:$0xff]  ;;  %v506_v2 = vld [vmem:[%s479_s18 + $0x10] sm:$0xff]  ;;  %v2101_v27 = vsub.s32 %v591_v17, %v2074_v16  ;;  %s926_s15 = sld [smem:[#allocation4]]  ;;  %s1954_s19 = smov 8  }
  0x26   : > { %v513_v3 = vadd.f32 %v505_v1, %v504_v0  ;;  %v507_v4 = vld [vmem:[%s479_s18 + $0x18] sm:$0xff]  ;;  %v508_v5 = vld [vmem:[%s489_s24] sm:$0xff]  ;;  %v509_v6 = vld [vmem:[%s489_s24 + $0x8] sm:$0xff]  ;;  %s1719_s18 = sld [smem:[#allocation4 + $0x3]] }
  0x27   : > { %v721_v7 = vadd.f32 %v509_v6, %v508_v5  ;;  %v510_v8 = vld [vmem:[%s489_s24 + $0x10] sm:$0xff]  ;;  %v511_v9 = vld [vmem:[%s489_s24 + $0x18] sm:$0xff]  ;;  %v516_v10 = vadd.f32 %v507_v4, %v506_v2 }
  0x28   : > { %514 = vadd.xlane.f32.xlu0 %v513_v3  ;;  %v724_v11 = vadd.f32 %v511_v9, %v510_v8 }
  0x29   : > { %722 = vadd.xlane.f32.xlu1 %v721_v7 }
  0x2c   : > { %517 = vadd.xlane.f32.xlu0 %v516_v10 }
  0x2d   : > { %725 = vadd.xlane.f32.xlu1 %v724_v11 }
  0xb5   : > { %v515_v26 = vpop.xlane.xlu0 %514 }
  0xb6   : > { %v723_v28 = vpop.xlane.xlu1 %722  ;;  %v524_v29 = vrot.slane %v515_v26, %v2077_v18  ;;  %v528_v30 = vrot.slane %v515_v26, %v2080_v19  ;;  %v532_v31 = vrot.slane %v515_v26, %v2083_v20  ;;  %v536_v32 = vrot.slane %v515_v26, %v2086_v21 }
  0xb7   : > { %v540_v33 = vrot.slane %v515_v26, %v2089_v22  ;;  %v544_v34 = vrot.slane %v515_v26, %v2092_v23  ;;  %v548_v35 = vrot.slane %v515_v26, %v2095_v24  ;;  %v552_v36 = vrot.slane %v515_v26, %v2098_v25 }
  0xb8   : > { %v585_v37 = vcombine.low %v524_v29, %v528_v30  ;;  %v586_v38 = vcombine.low %v532_v31, %v536_v32  ;;  %v732_v39 = vrot.slane %v723_v28, %v2077_v18  ;;  %v736_v40 = vrot.slane %v723_v28, %v2080_v19 }
  0xb9   : > { %v518_v41 = vpop.xlane.xlu0 %517  ;;  %v587_v42 = vcombine.low %v540_v33, %v544_v34  ;;  %v588_v43 = vcombine.low %v548_v35, %v552_v36  ;;  %v740_v44 = vrot.slane %v723_v28, %v2083_v20  ;;  %v744_v45 = vrot.slane %v723_v28, %v2086_v21 }
  0xba   : > { %v595_v46 = vrot.slane %v585_v37, %v2101_v27  ;;  %v602_v47 = vrot.slane %v586_v38, %v2101_v27  ;;  %v556_v48 = vrot.slane %v518_v41, %v2077_v18  ;;  %v560_v49 = vrot.slane %v518_v41, %v2080_v19  ;;  %v726_v2 = vpop.xlane.xlu1 %725 }
  0xbb   : > { %v609_v50 = vrot.slane %v587_v42, %v2101_v27  ;;  %v616_v51 = vrot.slane %v588_v43, %v2101_v27  ;;  %v564_v52 = vrot.slane %v518_v41, %v2083_v20  ;;  %v568_v53 = vrot.slane %v518_v41, %v2086_v21 }
  0xbc   : > { %v617_v54 = vcombine.low %v595_v46, %v602_v47  ;;  %v572_v55 = vrot.slane %v518_v41, %v2089_v22  ;;  %v576_v56 = vrot.slane %v518_v41, %v2092_v23  ;;  %v580_v57 = vrot.slane %v518_v41, %v2095_v24 }
  0xbd   : > { %v618_v58 = vcombine.low %v609_v50, %v616_v51  ;;  %v584_v59 = vrot.slane %v518_v41, %v2098_v25  ;;  %v634_v60 = vcombine.low %v556_v48, %v560_v49  ;;  %v635_v61 = vcombine.low %v564_v52, %v568_v53 }
  0xbe   : > { %v625_v62 = vrot.slane %v617_v54, %v2101_v27  ;;  %v636_v63 = vcombine.low %v572_v55, %v576_v56  ;;  %v748_v0 = vrot.slane %v723_v28, %v2089_v22  ;;  %v752_v1 = vrot.slane %v723_v28, %v2092_v23  ;;  %v941_v55 = vld [vmem:[%s2295_s3] sm:$0xff] }
  0xbf   : > { %v632_v3 = vrot.slane %v618_v58, %v2101_v27  ;;  %v637_v4 = vcombine.low %v580_v57, %v584_v59  ;;  %v644_v5 = vrot.slane %v634_v60, %v2101_v27  ;;  %v651_v6 = vrot.slane %v635_v61, %v2101_v27  ;;  %v1098_v56 = vld [vmem:[%s2297_s5] sm:$0xff] }
  0xc0   : > { %v658_v7 = vrot.slane %v636_v63, %v2101_v27  ;;  %v756_v8 = vrot.slane %v723_v28, %v2095_v24  ;;  %v760_v9 = vrot.slane %v723_v28, %v2098_v25  ;;  %v793_v10 = vcombine.low %v732_v39, %v736_v40 }
  0xc1   : > { %v633_v11 = vcombine.low %v625_v62, %v632_v3  ;;  %v665_v12 = vrot.slane %v637_v4, %v2101_v27  ;;  %v666_v14 = vcombine.low %v644_v5, %v651_v6  ;;  %v794_v15 = vcombine.low %v740_v44, %v744_v45 }
  0xc2   : > { %v795_v17 = vcombine.low %v748_v0, %v752_v1  ;;  %v796_v26 = vcombine.low %v756_v8, %v760_v9  ;;  %v803_v29 = vrot.slane %v793_v10, %v2101_v27  ;;  %v764_v30 = vrot.slane %v726_v2, %v2077_v18 }
  0xc3   : > { %684 = vperm.xlu0 %1899, %v633_v11   ;;  %v667_v31 = vcombine.low %v658_v7, %v665_v12  ;;  %v674_v32 = vrot.slane %v666_v14, %v2101_v27  ;;  %v810_v33 = vrot.slane %v794_v15, %v2101_v27  ;;  %v768_v28 = vrot.slane %v726_v2, %v2080_v19  ;;  %v942_v15 = vld [vmem:[%s2296_s4] sm:$0xff] }
  0xc4   : > { %v817_v34 = vrot.slane %v795_v17, %v2101_v27  ;;  %v824_v35 = vrot.slane %v796_v26, %v2101_v27  ;;  %v772_v36 = vrot.slane %v726_v2, %v2083_v20  ;;  %v776_v37 = vrot.slane %v726_v2, %v2086_v21  ;;  %v943_v17 = vld [vmem:[%s2296_s4 + $0x8] sm:$0xff] }
  0xc5   : > { %v681_v38 = vrot.slane %v667_v31, %v2101_v27  ;;  %v825_v39 = vcombine.low %v803_v29, %v810_v33  ;;  %v780_v18 = vrot.slane %v726_v2, %v2089_v22  ;;  %v784_v40 = vrot.slane %v726_v2, %v2092_v23  ;;  %v945_v33 = vld [vmem:[%s2296_s4 + $0x18] sm:$0xff] }
  0xc6   : > { %v826_v41 = vcombine.low %v817_v34, %v824_v35  ;;  %v788_v42 = vrot.slane %v726_v2, %v2095_v24  ;;  %v792_v19 = vrot.slane %v726_v2, %v2098_v25  ;;  %v842_v43 = vcombine.low %v764_v30, %v768_v28  ;;  %v1099_v34 = vld [vmem:[%s2298_s6] sm:$0xff]  ;;  %v1100_v35 = vld [vmem:[%s2298_s6 + $0x8] sm:$0xff] }
  0xc7   : > { %v682_v44 = vcombine.low %v674_v32, %v681_v38  ;;  %v833_v45 = vrot.slane %v825_v39, %v2101_v27  ;;  %v843_v46 = vcombine.low %v772_v36, %v776_v37  ;;  %v844_v20 = vcombine.low %v780_v18, %v784_v40  ;;  %v944_v32 = vld [vmem:[%s2296_s4 + $0x10] sm:$0xff]  ;;  %v1102_v39 = vld [vmem:[%s2298_s6 + $0x18] sm:$0xff] }
  0xc8   : > { %v840_v21 = vrot.slane %v826_v41, %v2101_v27  ;;  %v845_v47 = vcombine.low %v788_v42, %v792_v19  ;;  %v852_v48 = vrot.slane %v842_v43, %v2101_v27  ;;  %v1947_v49 = vmov 0.0   ;;  %v1101_v38 = vld [vmem:[%s2298_s6 + $0x10] sm:$0xff] }
  0xc9   : > { %687 = vperm.xlu1 %1900, %v682_v44   ;;  %v859_v22 = vrot.slane %v843_v46, %v2101_v27  ;;  %v866_v23 = vrot.slane %v844_v20, %v2101_v27  ;;  %502 = vst.msk [vmem:[#allocation2] sm:$0x1] %vm501_vm0, %v1947_v49  ;;  %503 = vst.msk [vmem:[#allocation3] sm:$0x1] %vm501_vm0, %v1947_v49  ;;  %1760 = vmatprep.subr.mxu1 %v1947_v49  ;;  %v690_v57 = vand.u32 127, %v521_v13  ;;  %v1949_v14 = vmov 0.0|0.0  }
  0xca   : > { %v841_v24 = vcombine.low %v833_v45, %v840_v21  ;;  %v873_v25 = vrot.slane %v845_v47, %v2101_v27  ;;  %1776 = vmatprep.subr.mxu0 %v1947_v49  ;;  %1761 = vmatpush3.msra.mxu1 %v941_v55  ;;  %v1827_v30 = vpack.c.bf16 %v943_v17, %v942_v15  ;;  %v1021_v40 = vstv %s926_s15  ;;  %v1254_v44 = vld [vmem:[%s2299_s7] sm:$0xff]  ;;  %v1255_v45 = vld [vmem:[%s2299_s7 + $0x8] sm:$0xff]  ;;  %v1259_v55 = vld [vmem:[%s2300_s8 + $0x18] sm:$0xff] }
  0xcb   : > { %v874_v50 = vcombine.low %v852_v48, %v859_v22  ;;  %1762 = vmatprep.mubr.msk.f32.mxu1 %vm1948_vm1, %v1947_v49  ;;  %1778 = vmatprep.mubr.msk.f32.mxu0 %vm1948_vm1, %v1947_v49  ;;  %v695_v58 = vadd.s32 4294967288, %v690_v57  ;;  %v693_v59 = vsub.s32 %v690_v57, %v2074_v16  ;;  %v1830_v28 = vpack.c.bf16 %v945_v33, %v944_v32  ;;  %v1413_v22 = vld [vmem:[%s2301_s9] sm:$0xff] }
  0xcc   : > { %v875_v51 = vcombine.low %v866_v23, %v873_v25  ;;  %1777 = vmatpush3.msra.mxu0 %v1098_v56  ;;  %1826 = vmatprep.subr.bf16.mxu1 %v1949_v14  ;;  %v1833_v36 = vpack.c.bf16 %v1100_v35, %v1099_v34  ;;  %v1836_v18 = vpack.c.bf16 %v1102_v39, %v1101_v38  ;;  %v1178_v20 = vstv %s1717_s20  ;;  %v1257_v25 = vld [vmem:[%s2300_s8 + $0x8] sm:$0xff]  ;;  %v1414_v57 = vld [vmem:[%s2302_s10] sm:$0xff] }
  0xcd   : > { %892 = vperm.xlu1 %1900, %v841_v24   ;;  %v882_v52 = vrot.slane %v874_v50, %v2101_v27  ;;  %v698_v60 = vsub.s32 %v695_v58, %v2074_v16  ;;  %1832 = vmatprep.subr.bf16.mxu0 %v1949_v14  ;;  %v1839_v46 = vpack.c.bf16 %v1255_v45, %v1254_v44  ;;  %v1256_v24 = vld [vmem:[%s2300_s8] sm:$0xff]  ;;  %v1415_v58 = vld [vmem:[%s2302_s10 + $0x8] sm:$0xff] }
  0xce   : > { %v889_v53 = vrot.slane %v875_v51, %v2101_v27  ;;  %v1842_v51 = vpack.c.bf16 %v1257_v25, %v1256_v24 }
  0xd0   : > { %v890_v54 = vcombine.low %v882_v52, %v889_v53  ;;  %v512_v4 = vld [vmem:[#allocation2] sm:$0x1]  ;;  %v720_v10 = vld [vmem:[#allocation3] sm:$0x1] }
  0xd2   : > { %895 = vperm.xlu1 %1900, %v890_v54   ;;  %v1258_v54 = vld [vmem:[%s2300_s8 + $0x10] sm:$0xff] }
  0xd3   : > { %v1845_v56 = vpack.c.bf16 %v1259_v55, %v1258_v54 }
 0x142   : > { %v685_v61 = vpop.permute.xlu0 %684 }
 0x143   : > { %v694_v63 = vrot.slane %v685_v61, %v693_v59 }
 0x148   : > { %v688_v62 = vpop.permute.xlu1 %687 }
 0x149   : > { %v699_v0 = vrot.slane %v688_v62, %v698_v60 }
 0x14b   : > { %v701_v1 = vsel %vm700_vm2, %v699_v0, %v694_v63  ;;  %v1416_v63 = vld [vmem:[%s2302_s10 + $0x10] sm:$0xff]  ;;  %v1417_v0 = vld [vmem:[%s2302_s10 + $0x18] sm:$0xff] }
 0x14c   : > { %v708_v2 = vrot.slane %v701_v1, %v2101_v27  ;;  %v893_v3 = vpop.permute.xlu1 %892  ;;  %v1851_v1 = vpack.c.bf16 %v1417_v0, %v1416_v63 }
 0x14d   : > { %v900_v13 = vrot.slane %v893_v3, %v693_v59 }
 0x14e   : > { %v715_v5 = vrot.slane %v708_v2, %v2101_v27  ;;  %v1336_v2 = vstv %s1718_s14 }
 0x150   : > { %v717_v6 = vadd.f32 %v715_v5, %v512_v4 }
 0x151   : > { %v896_v7 = vpop.permute.xlu1 %895 }
 0x152   : > { %719 = vst.msk [vmem:[#allocation2] sm:$0x1] %vm501_vm0, %v717_v6  ;;  %v904_v8 = vrot.slane %v896_v7, %v698_v60  ;;  %v1848_v60 = vpack.c.bf16 %v1415_v58, %v1414_v57 }
 0x154   : > { %v905_v9 = vsel %vm700_vm2, %v904_v8, %v900_v13 }
 0x155   : > { %v912_v16 = vrot.slane %v905_v9, %v2101_v27 }
 0x157   : > { %v919_v11 = vrot.slane %v912_v16, %v2101_v27 }
 0x159   : > { %v921_v12 = vadd.f32 %v919_v11, %v720_v10  ;;  %v930_v26 = vld [vmem:[#allocation2] sm:$0x1]  ;;  %v1493_v10 = vstv %s1719_s18 }
 0x15b   : > { %922 = vst.msk [vmem:[#allocation3] sm:$0x1] %vm501_vm0, %v921_v12 }
 0x162   : > { %v1720_v29 = vld [vmem:[#allocation3] ss:$0 sm:$0xff] }
 0x163   : > { %v939_v27 = vsel %vm938_vm3, %v930_v26, %v1720_v29 }
 0x164   : > { %v940_v31 = vmul.f32 0.00390625, %v939_v27 }
 0x166   : > { %1103 = vrot.lane.b32.xlu1 %v940_v31, %s1950_s16  ;;  %1763 = vmatmul.mubr.msk.f32.vlgmr.msra.gmra.mrb[0].mxu1 %vm946_vm4, %v940_v31 }
 0x167   : > { %1828 = vmatpush3.bf16.msra.mxu1 %v1827_v30  ;;  %1773 = vmatprep.mubr.msk.f32.mxu1 %vm1948_vm1, %v1947_v49 }
 0x168   : > { %1829 = vmatprep.subr.bf16.mxu1 %v1949_v14 }
 0x16b   : > { %1831 = vmatpush3.bf16.msra.mxu1 %v1830_v28 }
 0x16c   : > { %1838 = vmatprep.subr.bf16.mxu1 %v1949_v14 }
 0x1d8   : > { %v1104_v37 = vpop.permute.xlu1 %1103 }
 0x1d9   : > { %1779 = vmatmul.mubr.msk.f32.vlgmr.msra.gmra.mrb[0].mxu0 %vm946_vm4, %v1104_v37 }
 0x1da   : > { %1834 = vmatpush3.bf16.msra.mxu0 %v1833_v36  ;;  %1789 = vmatprep.mubr.msk.f32.mxu0 %vm1948_vm1, %v1947_v49 }
 0x1db   : > { %1835 = vmatprep.subr.bf16.mxu0 %v1949_v14 }
 0x1de   : > { %1837 = vmatpush3.bf16.msra.mxu0 %v1836_v18 }
 0x1df   : > { %1810 = vmatprep.subr.mxu0 %v1947_v49 }
 0x239   : > { %v1016_v41 = vpop.f32.mrb[0].mxu1 }
 0x23a   : > { %vm1020_vm5 = vcmp.ge.f32.partialorder %v1016_v41, 0.0  ;;  %v1022_v42 = vmul.f32 %v1021_v40, %v1016_v41  ;;  %v1764_v19 = vpop.f32.mrb[1].mxu1 }
 0x23c   : > { %v1023_v43 = vsel %vm1020_vm5, %v1016_v41, %v1022_v42 }
 0x23d   : > { %1774 = vmatmul.mubr.msk.f32.vlgmr.msra.gmra.mrb[2].mxu1 %vm1024_vm6, %v1023_v43 }
 0x23e   : > { %1796 = vmatprep.mubr.msk.f32.mxu1 %vm1948_vm1, %v1947_v49  ;;  %1840 = vmatpush3.bf16.msra.mxu1 %v1839_v46 }
 0x23f   : > { %1841 = vmatprep.subr.bf16.mxu1 %v1949_v14 }
 0x2ac   : > { %v1173_v21 = vpop.f32.mrb[0].mxu0 }
 0x2ad   : > { %vm1177_vm7 = vcmp.ge.f32.partialorder %v1173_v21, 0.0  ;;  %v1179_v47 = vmul.f32 %v1178_v20, %v1173_v21  ;;  %v1780_v48 = vpop.f32.mrb[1].mxu0 }
 0x2af   : > { %v1180_v23 = vsel %vm1177_vm7, %v1173_v21, %v1179_v47 }
 0x2b0   : > { %1790 = vmatmul.mubr.msk.f32.vlgmr.msra.gmra.mrb[2].mxu0 %vm1024_vm6, %v1180_v23 }
 0x2b1   : > { %1811 = vmatpush3.msra.mxu0 %v1413_v22  ;;  %1812 = vmatprep.mubr.msk.f32.mxu0 %vm1948_vm1, %v1947_v49 }
 0x2b2   : > { %1847 = vmatprep.subr.bf16.mxu0 %v1949_v14 }
 0x310   : > { %v1094_v50 = vpop.f32.mrb[2].mxu1 }
 0x311   : > { %v1261_v52 = vrot.slane %v1094_v50, 1  ;;  %v1775_v53 = vpop.f32.mrb[3].mxu1 }
 0x313   : > { %1570 = vrot.lane.b32.xlu1 %v1261_v52, %s1951_s13  ;;  %1797 = vmatmul.mubr.msk.f32.vlgmr.msra.gmra.mrb[4].mxu1 %vm1262_vm8, %v1261_v52 }
 0x314   : > { %1843 = vmatpush3.bf16.msra.mxu1 %v1842_v51  ;;  %1807 = vmatprep.mubr.msk.f32.mxu1 %vm1948_vm1, %v1947_v49 }
 0x315   : > { %1844 = vmatprep.subr.bf16.mxu1 %v1949_v14 }
 0x318   : > { %1846 = vmatpush3.bf16.msra.mxu1 %v1845_v56 }
 0x383   : > { %v1250_v59 = vpop.f32.mrb[2].mxu0 }
 0x384   : > { %v1419_v61 = vrot.slane %v1250_v59, 1  ;;  %v1791_v62 = vpop.f32.mrb[3].mxu0  ;;  %1573 = vrot.lane.b32.xlu1 %v1250_v59, %s1952_s26  ;;  %s496_s26 = scalar_lea.vmem %s2304_s12, %s2312_s21 }
 0x385   : > { %v1571_v6 = vpop.permute.xlu1 %1570 }
 0x386   : > { %1813 = vmatmul.mubr.msk.f32.vlgmr.msra.gmra.mrb[4].mxu0 %vm946_vm4, %v1419_v61  ;;  %v1579_v13 = vsel %vm1262_vm8, %v1094_v50, %v1571_v6 }
 0x387   : > { %1849 = vmatpush3.bf16.msra.mxu0 %v1848_v60  ;;  %1823 = vmatprep.mubr.msk.f32.mxu0 %vm1948_vm1, %v1947_v49 }
 0x388   : > { %1576 = vrot.lane.b32.xlu1 %v1419_v61, %s1953_s27  ;;  %1850 = vmatprep.subr.bf16.mxu0 %v1949_v14 }
 0x38b   : > { %1852 = vmatpush3.bf16.msra.mxu0 %v1851_v1 }
 0x3e6   : > { %v1331_v3 = vpop.f32.mrb[4].mxu1 }
 0x3e7   : > { %vm1335_vm9 = vcmp.ge.f32.partialorder %v1331_v3, 0.0  ;;  %v1337_v49 = vmul.f32 %v1336_v2, %v1331_v3  ;;  %v1798_v4 = vpop.f32.mrb[5].mxu1 }
 0x3e9   : > { %v1338_v5 = vsel %vm1335_vm9, %v1331_v3, %v1337_v49 }
 0x3ea   : > { %1808 = vmatmul.mubr.msk.f32.vlgmr.msra.gmra.mrb[6].mxu1 %vm1024_vm6, %v1338_v5 }
 0x3f6   : > { %v1574_v7 = vpop.permute.xlu1 %1573 }
 0x3f7   : > { %v1580_v8 = vsel %vm1024_vm6, %v1579_v13, %v1574_v7 }
 0x3fa   : > { %v1577_v9 = vpop.permute.xlu1 %1576 }
 0x3fb   : > { %v1582_v16 = vsel %vm1581_vm10, %v1580_v8, %v1577_v9 }
 0x3fc   : > { %1584 = vst.msk [vmem:[%s493_s17] sm:$0x1] %vm1583_vm11, %v1582_v16 }
 0x459   : > { %v1488_v11 = vpop.f32.mrb[4].mxu0 }
 0x45a   : > { %vm1492_vm12 = vcmp.ge.f32.partialorder %v1488_v11, 0.0  ;;  %v1494_v12 = vmul.f32 %v1493_v10, %v1488_v11  ;;  %v1814_v14 = vpop.f32.mrb[5].mxu0 }
 0x45c   : > { %v1495_v15 = vsel %vm1492_vm12, %v1488_v11, %v1494_v12 }
 0x45d   : > { %1824 = vmatmul.mubr.msk.f32.vlgmr.msra.gmra.mrb[6].mxu0 %vm1024_vm6, %v1495_v15 }
 0x4bd   : > { %v1408_v17 = vpop.f32.mrb[6].mxu1 }
 0x4be   : > { %v1809_v26 = vpop.f32.mrb[7].mxu1  ;;  %v1412_v31 = vmax.f32 %v1408_v17, 0.0 }
 0x530   : > { %v1565_v29 = vpop.f32.mrb[6].mxu0 }
 0x531   : > { %v1569_v27 = vmax.f32 %v1565_v29, 0.0  ;;  %v1825_v30 = vpop.f32.mrb[7].mxu0 }
 0x533   : > { %1586 = vrot.lane.b32.xlu1 %v1569_v27, %s1954_s19 }
 0x5a5   : > { %v1587_v32 = vpop.permute.xlu1 %1586 }
 0x5a6   : > { %v1589_v33 = vsel %vm946_vm4, %v1412_v31, %v1587_v32 }
 0x5a7   : > { %1590 = vst.msk [vmem:[%s496_s26] sm:$0x1] %vm501_vm0, %v1589_v33 }
 0x5a8 PF: > { %s24_s23 = sadd.s32 1, %s1942_s23   ;;  %s2307_s21 = smov %s1938_s22 }
 0x5a9   : > { %p21_p2 = scmp.ge.s32.totalorder %s24_s23, 4   ;;  %s2308_s22 = smov %s2310_s25 }
 0x5ab   :  { %23 = sbr.rel (!%p21_p2) target bundleno = 2 (0x2), region = 122 }
 0x5b2   :  { %1620 = vsyncpa [#allocation5], 1 }
 0x5b3   :  { %1622 = vsyncpa [#allocation5 + $0x1], 1 }

</bundles_post_ra>
